<compile_context>
chip_gen: v7x
topology: tpu7x:2x2x1
jax: 0.10.0
libtpu: 0.0.40
codegen_flags: <defaults>
</compile_context>

<pallas_src>
import jax
import jax.numpy as jnp
from jax.experimental import pallas as pl
from jax.experimental.pallas import tpu as pltpu

_LANE = 128


def _round_up(n, m):
    return ((n + m - 1) // m) * m


def _cdiv(a, b):
    return (a + b - 1) // b


def mlp_kernel(xt_ref, w1_ref, b1_ref, w2_ref, b2_ref, w3_ref, b3_ref, ot_ref):
    """Feature-major MLP tile: every operand is (features, batch_tile)."""
    xt = xt_ref[...]                                              # (14, TB)

    # Layer 1: (20,14) @ (14,TB) + (20,1) -> ReLU
    h1 = jnp.dot(w1_ref[...], xt, preferred_element_type=jnp.float32)
    h1 = jnp.maximum(h1 + b1_ref[...], 0.0)                       # (20, TB) f32

    # Layer 2: (10,20) @ (20,TB) + (10,1) -> ReLU
    h2 = jnp.dot(w2_ref[...], h1.astype(w2_ref.dtype),
                 preferred_element_type=jnp.float32)
    h2 = jnp.maximum(h2 + b2_ref[...], 0.0)                       # (10, TB) f32

    # Layer 3: (6,10) @ (10,TB) + (6,1) -> straight to the output ref
    out = jnp.dot(w3_ref[...], h2.astype(w3_ref.dtype),
                  preferred_element_type=jnp.float32) + b3_ref[...]
    ot_ref[...] = out.astype(ot_ref.dtype)                        # (6, TB)


def _choose_tiling(batch, max_tile):
    """Pick (tile, n_tiles, padded_batch) with tile a multiple of 128."""
    max_tile = _round_up(max(max_tile, _LANE), _LANE)
    n_tiles = max(1, _cdiv(batch, max_tile))          # respect max_tile
    if batch >= 2 * _LANE:                            # v7x megacore: >=2 steps
        n_tiles = max(n_tiles, 2)
    tile = _round_up(_cdiv(batch, n_tiles), _LANE)    # near-full last block
    return tile, n_tiles, n_tiles * tile


def neural_net_forward(x, params, *, max_tile=32768, compute_dtype=jnp.bfloat16):
    """x: (B, 14) float32 (PyTorch nn.Linear layout).  Returns (B, 6) float32."""
    batch, f_in = x.shape

    # Feature-major weights: (out, in) so the kernel computes W @ x_t.
    w1 = params["w1"].T.astype(compute_dtype)               # (20, 14)
    w2 = params["w2"].T.astype(compute_dtype)               # (10, 20)
    w3 = params["w3"].T.astype(compute_dtype)               # (6, 10)
    b1 = params["b1"].reshape(-1, 1).astype(jnp.float32)    # (20, 1)
    b2 = params["b2"].reshape(-1, 1).astype(jnp.float32)    # (10, 1)
    b3 = params["b3"].reshape(-1, 1).astype(jnp.float32)    # (6, 1)
    h1_dim, h2_dim, f_out = w1.shape[0], w2.shape[0], w3.shape[0]

    tile, n_tiles, batch_pad = _choose_tiling(batch, max_tile)

    # Feature-major input (batch on lanes).  Pad only to the tile granularity.
    x_t = x.T.astype(compute_dtype)                          # (14, B)
    if batch_pad != batch:
        x_t = jnp.pad(x_t, ((0, 0), (0, batch_pad - batch)))

    # Weights/biases: constant block index -> fetched once, VMEM-resident.
    resident = lambda arr: pl.BlockSpec(arr.shape, lambda i: (0, 0))

    itemsize = jnp.dtype(compute_dtype).itemsize
    cost = pl.CostEstimate(
        flops=2 * batch_pad * (f_in * h1_dim + h1_dim * h2_dim + h2_dim * f_out),
        transcendentals=0,
        bytes_accessed=(f_in * batch_pad * itemsize            # input
                        + f_out * batch_pad * 4                # output (f32)
                        + (w1.size + w2.size + w3.size) * itemsize
                        + (b1.size + b2.size + b3.size) * 4),
    )

    out_t = pl.pallas_call(
        mlp_kernel,
        out_shape=jax.ShapeDtypeStruct((f_out, batch_pad), jnp.float32),
        grid=(n_tiles,),
        in_specs=[
            pl.BlockSpec((f_in, tile), lambda i: (0, i)),
            resident(w1), resident(b1),
            resident(w2), resident(b2),
            resident(w3), resident(b3),
        ],
        out_specs=pl.BlockSpec((f_out, tile), lambda i: (0, i)),
        compiler_params=pltpu.CompilerParams(
            dimension_semantics=("parallel",),
            vmem_limit_bytes=48 * 1024 * 1024,
        ),
        cost_estimate=cost,
    )(x_t, w1, b1, w2, b2, w3, b3)

    out_t = out_t[:, :batch] if batch_pad != batch else out_t
    return out_t.T                                           # (B, 6) float32


def init_params(key):
    """PyTorch-style Linear init: U(-1/sqrt(fan_in), 1/sqrt(fan_in)).
    Weights stored as (in, out) so x @ W == x @ weight.T in PyTorch terms."""
    dims = [(14, 20), (20, 10), (10, 6)]
    params = {}
    for i, (fan_in, fan_out) in enumerate(dims, start=1):
        key, kw, kb = jax.random.split(key, 3)
        bound = 1.0 / jnp.sqrt(float(fan_in))
        params[f"w{i}"] = jax.random.uniform(
            kw, (fan_in, fan_out), jnp.float32, minval=-bound, maxval=bound)
        params[f"b{i}"] = jax.random.uniform(
            kb, (1, fan_out), jnp.float32, minval=-bound, maxval=bound)
    return params


def reference_forward(x, params):
    h1 = jnp.maximum(x @ params["w1"] + params["b1"], 0.0)
    h2 = jnp.maximum(h1 @ params["w2"] + params["b2"], 0.0)
    return h2 @ params["w3"] + params["b3"]


if __name__ == "__main__":
    key = jax.random.PRNGKey(0)
    kparams, kx1, kx2 = jax.random.split(key, 3)
    params = init_params(kparams)

    fwd = jax.jit(neural_net_forward,
                  static_argnames=("max_tile", "compute_dtype"))

    # Small batch, f32 compute path (single 128-wide tile, padded lanes).
    B1 = 8
    x1 = jax.random.normal(kx1, (B1, 14), dtype=jnp.float32)
    out1 = jax.block_until_ready(fwd(x1, params, compute_dtype=jnp.float32))
    ref1 = reference_forward(x1, params)
    assert out1.shape == (B1, 6), out1.shape
    assert jnp.allclose(out1, ref1, atol=1e-2, rtol=1e-2), "mismatch (f32, B=8)"

    # Non-aligned batch, default bf16 compute: exercises padding + the 2-step
    # "parallel" grid (tile=256, grid=(2,) for B=300).
    B2 = 300
    x2 = jax.random.normal(kx2, (B2, 14), dtype=jnp.float32)
    out2 = jax.block_until_ready(fwd(x2, params))
    ref2 = reference_forward(x2, params)
    assert out2.shape == (B2, 6), out2.shape
    assert jnp.allclose(out2, ref2, atol=3e-2, rtol=3e-2), "mismatch (bf16, B=300)"

    print("KERNEL_OK")
</pallas_src>

<mosaic_0001>
module attributes {stable_mosaic.version = 11 : i64} {
  func.func @mlp_kernel(%arg0: i32, %arg1: memref<14x128xf32, #tpu.memory_space<vmem>>, %arg2: memref<20x14xf32, #tpu.memory_space<vmem>>, %arg3: memref<20x1xf32, #tpu.memory_space<vmem>>, %arg4: memref<10x20xf32, #tpu.memory_space<vmem>>, %arg5: memref<10x1xf32, #tpu.memory_space<vmem>>, %arg6: memref<6x10xf32, #tpu.memory_space<vmem>>, %arg7: memref<6x1xf32, #tpu.memory_space<vmem>>, %arg8: memref<6x128xf32, #tpu.memory_space<vmem>>) attributes {dimension_semantics = [#tpu.dimension_semantics<parallel>], iteration_bounds = array<i64: 1>, scalar_prefetch = 0 : i64, scratch_operands = 0 : i64, tpu.core_type = #tpu.core_type<tc>, window_params = [{transform_indices = @transform_0, window_bounds = array<i64: 14, 128>}, {pipeline_mode = #tpu.pipeline_mode<synchronous>, transform_indices = @transform_1, window_bounds = array<i64: 20, 14>}, {pipeline_mode = #tpu.pipeline_mode<synchronous>, transform_indices = @transform_2, window_bounds = array<i64: 20, 1>}, {pipeline_mode = #tpu.pipeline_mode<synchronous>, transform_indices = @transform_3, window_bounds = array<i64: 10, 20>}, {pipeline_mode = #tpu.pipeline_mode<synchronous>, transform_indices = @transform_4, window_bounds = array<i64: 10, 1>}, {pipeline_mode = #tpu.pipeline_mode<synchronous>, transform_indices = @transform_5, window_bounds = array<i64: 6, 10>}, {pipeline_mode = #tpu.pipeline_mode<synchronous>, transform_indices = @transform_6, window_bounds = array<i64: 6, 1>}, {transform_indices = @transform_7, window_bounds = array<i64: 6, 128>}]} {
    %c0 = arith.constant 0 : index
    %c0_0 = arith.constant 0 : index
    %0 = vector.load %arg1[%c0, %c0_0] : memref<14x128xf32, #tpu.memory_space<vmem>>, vector<14x128xf32>
    %c0_1 = arith.constant 0 : index
    %c0_2 = arith.constant 0 : index
    %1 = vector.load %arg2[%c0_1, %c0_2] : memref<20x14xf32, #tpu.memory_space<vmem>>, vector<20x14xf32>
    %cst = arith.constant dense<0.000000e+00> : vector<20x128xf32>
    %2 = tpu.matmul %1, %0, %cst {dimension_numbers = #tpu.dot_dimension_numbers<[1], [0], [0], [1], [0, 0, 1, 1], [], []>} : vector<20x14xf32>, vector<14x128xf32>, vector<20x128xf32> -> vector<20x128xf32>
    %c0_3 = arith.constant 0 : index
    %c0_4 = arith.constant 0 : index
    %3 = vector.load %arg3[%c0_3, %c0_4] : memref<20x1xf32, #tpu.memory_space<vmem>>, vector<20x1xf32>
    %4 = vector.broadcast %3 : vector<20x1xf32> to vector<20x128xf32>
    %5 = arith.addf %2, %4 : vector<20x128xf32>
    %cst_5 = arith.constant 0.000000e+00 : f32
    %6 = vector.broadcast %cst_5 : f32 to vector<20x128xf32>
    %7 = arith.maximumf %5, %6 : vector<20x128xf32>
    %c0_6 = arith.constant 0 : index
    %c0_7 = arith.constant 0 : index
    %8 = vector.load %arg4[%c0_6, %c0_7] : memref<10x20xf32, #tpu.memory_space<vmem>>, vector<10x20xf32>
    %cst_8 = arith.constant dense<0.000000e+00> : vector<10x128xf32>
    %9 = tpu.matmul %8, %7, %cst_8 {dimension_numbers = #tpu.dot_dimension_numbers<[1], [0], [0], [1], [0, 0, 1, 1], [], []>} : vector<10x20xf32>, vector<20x128xf32>, vector<10x128xf32> -> vector<10x128xf32>
    %c0_9 = arith.constant 0 : index
    %c0_10 = arith.constant 0 : index
    %10 = vector.load %arg5[%c0_9, %c0_10] : memref<10x1xf32, #tpu.memory_space<vmem>>, vector<10x1xf32>
    %11 = vector.broadcast %10 : vector<10x1xf32> to vector<10x128xf32>
    %12 = arith.addf %9, %11 : vector<10x128xf32>
    %cst_11 = arith.constant 0.000000e+00 : f32
    %13 = vector.broadcast %cst_11 : f32 to vector<10x128xf32>
    %14 = arith.maximumf %12, %13 : vector<10x128xf32>
    %c0_12 = arith.constant 0 : index
    %c0_13 = arith.constant 0 : index
    %15 = vector.load %arg6[%c0_12, %c0_13] : memref<6x10xf32, #tpu.memory_space<vmem>>, vector<6x10xf32>
    %cst_14 = arith.constant dense<0.000000e+00> : vector<6x128xf32>
    %16 = tpu.matmul %15, %14, %cst_14 {dimension_numbers = #tpu.dot_dimension_numbers<[1], [0], [0], [1], [0, 0, 1, 1], [], []>} : vector<6x10xf32>, vector<10x128xf32>, vector<6x128xf32> -> vector<6x128xf32>
    %c0_15 = arith.constant 0 : index
    %c0_16 = arith.constant 0 : index
    %17 = vector.load %arg7[%c0_15, %c0_16] : memref<6x1xf32, #tpu.memory_space<vmem>>, vector<6x1xf32>
    %18 = vector.broadcast %17 : vector<6x1xf32> to vector<6x128xf32>
    %19 = arith.addf %16, %18 : vector<6x128xf32>
    %c0_17 = arith.constant 0 : index
    %c0_18 = arith.constant 0 : index
    %20 = vector.load %arg8[%c0_17, %c0_18] : memref<6x128xf32, #tpu.memory_space<vmem>>, vector<6x128xf32>
    tpu.vector_store %arg8[%c0_17, %c0_18], %19 {strides = array<i32>} : memref<6x128xf32, #tpu.memory_space<vmem>>, vector<6x128xf32>,
    return
  }
  func.func @transform_0(%arg0: i32) -> (i32, i32) {
    %c0_i32 = arith.constant 0 : i32
    %c0_i32_0 = arith.constant 0 : i32
    return %c0_i32, %arg0 : i32, i32
  }
  func.func @transform_1(%arg0: i32) -> (i32, i32) {
    %c0_i32 = arith.constant 0 : i32
    %c0_i32_0 = arith.constant 0 : i32
    %c0_i32_1 = arith.constant 0 : i32
    return %c0_i32, %c0_i32_0 : i32, i32
  }
  func.func @transform_2(%arg0: i32) -> (i32, i32) {
    %c0_i32 = arith.constant 0 : i32
    %c0_i32_0 = arith.constant 0 : i32
    %c0_i32_1 = arith.constant 0 : i32
    return %c0_i32, %c0_i32_0 : i32, i32
  }
  func.func @transform_3(%arg0: i32) -> (i32, i32) {
    %c0_i32 = arith.constant 0 : i32
    %c0_i32_0 = arith.constant 0 : i32
    %c0_i32_1 = arith.constant 0 : i32
    return %c0_i32, %c0_i32_0 : i32, i32
  }
  func.func @transform_4(%arg0: i32) -> (i32, i32) {
    %c0_i32 = arith.constant 0 : i32
    %c0_i32_0 = arith.constant 0 : i32
    %c0_i32_1 = arith.constant 0 : i32
    return %c0_i32, %c0_i32_0 : i32, i32
  }
  func.func @transform_5(%arg0: i32) -> (i32, i32) {
    %c0_i32 = arith.constant 0 : i32
    %c0_i32_0 = arith.constant 0 : i32
    %c0_i32_1 = arith.constant 0 : i32
    return %c0_i32, %c0_i32_0 : i32, i32
  }
  func.func @transform_6(%arg0: i32) -> (i32, i32) {
    %c0_i32 = arith.constant 0 : i32
    %c0_i32_0 = arith.constant 0 : i32
    %c0_i32_1 = arith.constant 0 : i32
    return %c0_i32, %c0_i32_0 : i32, i32
  }
  func.func @transform_7(%arg0: i32) -> (i32, i32) {
    %c0_i32 = arith.constant 0 : i32
    %c0_i32_0 = arith.constant 0 : i32
    return %c0_i32, %arg0 : i32, i32
  }
}

</mosaic_0001>

<bundles_post_ra>
// kernel: neural_net_forward.1
= control target key start
LH: loop header
LB: loop body
LE: loop exit
PB: predicated region body
PF: predicated region fallthrough
CT: control target
= control target key end

     0   :  { %vm59_vm0 = vcmask 1045504   ;;  %v408_v0 = vmov 0.0|0.0   ;;  %vm409_vm1 = vmmov 1   ;;  %vm410_vm3 = vmmov 0   ;;  %s511_s0 = inlined_call_operand.vmem [shape: f32[14,128], index: 0, kind: input, shape index: {}]   ;;  %s512_s2 = inlined_call_operand.vmem [shape: f32[20,1], index: 2, kind: input, shape index: {}]   ;;  %s513_s1 = inlined_call_operand.vmem [shape: f32[20,14], index: 1, kind: input, shape index: {}]   ;;  %s514_s4 = inlined_call_operand.vmem [shape: f32[10,1], index: 4, kind: input, shape index: {}]   ;;  %s515_s6 = inlined_call_operand.vmem [shape: f32[6,1], index: 6, kind: input, shape index: {}]   ;;  %s516_s3 = inlined_call_operand.vmem [shape: f32[10,20], index: 3, kind: input, shape index: {}]   ;;  %s517_s5 = inlined_call_operand.vmem [shape: f32[6,10], index: 5, kind: input, shape index: {}]   ;;  %s518_s7 = inlined_call_operand.vmem [shape: f32[6,128], index: 7, kind: output, shape index: {}]  }
   0x1   :  { %389 = vmatprep.subr.bf16.mxu0 %v408_v0  ;;  %v26_v1 = vld [vmem:[%s511_s0] sm:$0xff]  ;;  %v27_v2 = vld [vmem:[%s511_s0 + $0x8] sm:$0x3f]  ;;  %vm391_vm2 = vmpackc.low %vm59_vm0, %vm409_vm1  ;;  %v411_v4 = vmov 0.0   ;;  %v412_v5 = vmov 0   ;;  %vm49_vm4 = vcmask 113664  }
   0x2   :  { %v390_v3 = vpack.c.bf16 %v27_v2, %v26_v1  ;;  %364 = vmatprep.mubr.msk.f32.mxu0 %vm410_vm3, %v411_v4  ;;  %406 = vset.pattern.permute.xlu0 %v412_v5  ;;  %v31_v6 = vld [vmem:[%s512_s2] sm:$0xff]  ;;  %v33_v8 = vld [vmem:[%s512_s2 + $0x10] sm:$0xf]  ;;  %v32_v9 = vld [vmem:[%s512_s2 + $0x8] sm:$0xff]  ;;  %vm160_vm5 = vcmask 162816   ;;  %vm167_vm6 = vcmask 1043456  }
   0x3   :  { %407 = vset.pattern.permute.xlu1 %v412_v5  ;;  %v28_v7 = vld [vmem:[%s513_s1] sm:$0xff]  ;;  %36 = vperm.xlu0 %406, %v31_v6   ;;  %v29_v11 = vld [vmem:[%s513_s1 + $0x8] sm:$0xff]  ;;  %v30_v14 = vld [vmem:[%s513_s1 + $0x10] sm:$0xf]  ;;  %vm259_vm7 = vcmask 1041408   ;;  %vm255_vm9 = vcmask 80896  }
   0x4   :  { %392 = vmatpush3.bf16.msk.msra.mxu0 %vm391_vm2, %v390_v3  ;;  %46 = vperm.xlu1 %407, %v33_v8   ;;  %v148_v10 = vld [vmem:[%s514_s4] sm:$0xff]  ;;  %v149_v12 = vld [vmem:[%s514_s4 + $0x8] sm:$0x3]  ;;  %vm399_vm8 = vmpackc.low %vm259_vm7, %vm409_vm1 }
   0x5   :  { %v249_v13 = vld [vmem:[%s515_s6] sm:$0x3f]  ;;  %v147_v32 = vld [vmem:[%s516_s3 + $0x8] sm:$0x3] }
   0x6   :  { %v146_v15 = vld [vmem:[%s516_s3] sm:$0xff] }
   0x7   :  { %365 = vmatmul.mubr.msk.f32.vlgmr.msra.gmra.mrb[0].mxu0 %vm49_vm4, %v28_v7  ;;  %41 = vperm.xlu0 %406, %v32_v9   ;;  %v248_v42 = vld [vmem:[%s517_s5] sm:$0x3f] }
   0x8   :  { %367 = vmatprep.mubr.msk.f32.mxu0 %vm410_vm3, %v411_v4  ;;  %152 = vperm.xlu1 %407, %v148_v10  }
   0x9   :  { %379 = vmatprep.mubr.msk.f32.mxu1 %vm160_vm5, %v146_v15 }
   0xb   :  { %368 = vmatmul.mubr.msk.f32.gmra.mrb[2].mxu0 %vm49_vm4, %v29_v11  ;;  %157 = vperm.xlu0 %406, %v149_v12  }
   0xc   :  { %370 = vmatprep.mubr.msk.f32.mxu0 %vm410_vm3, %v411_v4  ;;  %252 = vperm.xlu1 %407, %v249_v13  }
   0xf   :  { %371 = vmatmul.mubr.msk.f32.gmra.mrb[4].mxu0 %vm49_vm4, %v30_v14 }
  0x82   :  { %v37_v16 = vpop.permute.xlu0 %36 }
  0x83   :  { %v47_v26 = vpop.permute.xlu1 %46 }
  0x86   :  { %v42_v20 = vpop.permute.xlu0 %41 }
  0x87   :  { %v153_v35 = vpop.permute.xlu1 %152 }
  0x8a   :  { %v158_v33 = vpop.permute.xlu0 %157 }
  0x8b   :  { %v253_v43 = vpop.permute.xlu1 %252 }
  0xda   :  { %v129_v17 = vpop.f32.mrb[0].mxu0 }
  0xdb   :  { %v366_v18 = vpop.f32.mrb[1].mxu0  ;;  %v130_v19 = vadd.f32 %v129_v17, %v37_v16 }
  0xdd   :  { %v143_v24 = vmax.f32 %v130_v19, 0.0 }
  0xde   :  { %v134_v21 = vpop.f32.mrb[2].mxu0 }
  0xdf   :  { %v135_v22 = vadd.f32 %v134_v21, %v42_v20  ;;  %v369_v23 = vpop.f32.mrb[3].mxu0 }
  0xe1   :  { %v144_v25 = vmax.f32 %v135_v22, 0.0 }
  0xe2   :  { %v139_v27 = vpop.f32.mrb[4].mxu0 }
  0xe3   :  { %v140_v28 = vadd.f32 %v139_v27, %v47_v26  ;;  %v372_v29 = vpop.f32.mrb[5].mxu0  ;;  %v393_v30 = vpack.c.bf16 %v144_v25, %v143_v24 }
  0xe5   :  { %v145_v31 = vmax.f32 %v140_v28, 0.0  ;;  %394 = vmatprep.subr.bf16.mxu1 %v393_v30 }
  0xe6   :  { %396 = vmatpush3.bf16.msra.mxu1 %v393_v30 }
  0xe7   :  { %377 = vmatprep.subr.msk.mxu1 %vm167_vm6, %v145_v31 }
  0xea   :  { %378 = vmatpush3.msk.msra.mxu1 %vm167_vm6, %v145_v31 }
  0xeb   :  { %380 = vmatmul.mubr.msk.f32.vlgmr.msra.gmra.mrb[0].mxu1 %vm160_vm5, %v147_v32  ;;  %397 = vmatprep.subr.bf16.mxu1 %v408_v0 }
  0xec   :  { %386 = vmatprep.mubr.msk.f32.mxu1 %vm410_vm3, %v411_v4 }
 0x1be   :  { %v381_v34 = vpop.f32.mrb[0].mxu1 }
 0x1bf   :  { %v243_v36 = vadd.f32 %v381_v34, %v158_v33  ;;  %v237_v37 = vpop.f32.mrb[1].mxu1 }
 0x1c0   :  { %v238_v38 = vadd.f32 %v237_v37, %v153_v35 }
 0x1c1   :  { %v247_v39 = vmax.f32 %v243_v36, 0.0 }
 0x1c2   :  { %v246_v40 = vmax.f32 %v238_v38, 0.0 }
 0x1c4   :  { %v398_v41 = vpack.c.bf16 %v247_v39, %v246_v40 }
 0x1c6   :  { %400 = vmatpush3.bf16.msk.msra.mxu1 %vm399_vm8, %v398_v41 }
 0x1c9   :  { %387 = vmatmul.mubr.msk.f32.vlgmr.msra.gmra.mrb[2].mxu1 %vm255_vm9, %v248_v42 }
 0x29c   :  { %v329_v44 = vpop.f32.mrb[2].mxu1 }
 0x29d   :  { %v330_v45 = vadd.f32 %v329_v44, %v253_v43  ;;  %v388_v46 = vpop.f32.mrb[3].mxu1 }
 0x29f   :  { %333 = vst [vmem:[%s518_s7] sm:$0x3f] %v330_v45 }

</bundles_post_ra>
